<compile_context>
chip_gen: v5e
topology: v5e:2x2
jax: 0.10.0
libtpu: 0.0.40
codegen_flags: <defaults>
</compile_context>

<pallas_src>
import jax
import jax.numpy as jnp
from jax.experimental import pallas as pl
from jax.experimental.pallas import tpu as pltpu


def _feature_kernel(p_ref, w_ref, b_ref, o_ref):
    # p_ref: (36, T)   im2col patches^T, quadrant-major taps on sublanes,
    #                  batch/spatial positions on lanes (lane-dense)
    # w_ref: (256, 36) block-diagonal conv weight (resident across the grid)
    # b_ref: (64, 1)   bias (resident)
    # o_ref: (64, T)   pooled output tile, channel-major, lane-dense
    #
    # Conv2d(1,64,3,p=1) for all four 2x2-pool quadrants in a single GEMM.
    d = jnp.dot(w_ref[...], p_ref[...], preferred_element_type=jnp.float32)
    # MaxPool2d(2,2): elementwise max over the four per-quadrant 64-row slices.
    pooled = jnp.maximum(jnp.maximum(d[0:64], d[64:128]),
                         jnp.maximum(d[128:192], d[192:256]))
    # Pool-first, then bias, then ReLU (== conv -> +bias -> ReLU -> maxpool).
    o_ref[...] = jnp.maximum(pooled + b_ref[...], 0.0).astype(o_ref.dtype)


def _conv_taps(x):
    """x: (N,1,H,W) f32 -> (9,N,H,W); taps[3*dh+dw] = zero-padded x shifted by (dh,dw).

    Pure data-layout glue (pad/slice/stack, zero FLOPs); all arithmetic lives
    in the Pallas kernel.
    """
    n, c, h, w = x.shape
    assert c == 1
    xp = jnp.pad(x[:, 0], ((0, 0), (1, 1), (1, 1)))            # (N, H+2, W+2)
    return jnp.stack([xp[:, dh:dh + h, dw:dw + w]
                      for dh in range(3) for dw in range(3)], axis=0)


def _pick_tile(m, max_tile):
    """Lane-dense tile for an axis of length m.

    Returns the full extent for tiny m, otherwise a multiple of 128 capped at
    max_tile and at ~m/2 (so m >= 256 always yields >= 2 grid steps for the
    two v7x TensorCores).  The caller zero-pads m up to a tile multiple, so
    no single full-M fallback block is ever allocated.
    """
    if m <= 256:
        return m
    tile = min(max_tile, (m // 2) // 128 * 128)
    return max(tile, 128)


def _pad_last(a, new_size):
    pad = new_size - a.shape[-1]
    if pad == 0:
        return a
    cfg = [(0, 0)] * (a.ndim - 1) + [(0, pad)]
    return jnp.pad(a, cfg)


def feature_extractor(x, w_oihw, bias, *, max_tile_m=8192):
    """Forward of the PyTorch FeatureExtractor.  x: (N,1,H,W) f32 -> (N,64,H//2,W//2)."""
    n, c, h, w = x.shape
    assert c == 1
    # NOTE: PyTorch MaxPool2d(2,2) silently floors odd H/W; only even sizes here.
    assert h % 2 == 0 and w % 2 == 0
    hp, wp = h // 2, w // 2
    hw = hp * wp

    x = x.astype(jnp.float32)
    w_mat = w_oihw.reshape(64, 9).astype(jnp.float32)          # (64,9), k = 3*dh+dw
    # Block-diagonal weight: one (256,36)x(36,T) GEMM covers all 4 pool quadrants.
    w_blk = jnp.kron(jnp.eye(4, dtype=jnp.float32), w_mat)     # (256, 36)
    b_mat = bias.reshape(64, 1).astype(jnp.float32)            # (64, 1)

    taps = _conv_taps(x)                                        # (9, N, H, W)
    taps = taps.reshape(9, n, hp, 2, wp, 2)                     # [k, n, i, a, j, b]

    vmem_bytes = 48 * 1024 * 1024

    if hw >= 512:
        # --- Direct-NCHW path: no wrapper-side transpose over the output. ---
        tile = _pick_tile(hw, max_tile_m)
        hw_pad = pl.cdiv(hw, tile) * tile
        # P[n, 9*(2a+b)+k, i*wp+j] = x_pad[n, 2i+a+dh, 2j+b+dw]
        patches = taps.transpose(1, 3, 5, 0, 2, 4).reshape(n, 36, hw)
        patches = _pad_last(patches, hw_pad)
        out = pl.pallas_call(
            _feature_kernel,
            out_shape=jax.ShapeDtypeStruct((n, 64, hw_pad), jnp.float32),
            grid_spec=pltpu.PrefetchScalarGridSpec(
                num_scalar_prefetch=0,
                grid=(n, hw_pad // tile),
                in_specs=[
                    pl.BlockSpec((None, 36, tile), lambda nb, t: (nb, 0, t)),
                    pl.BlockSpec((256, 36), lambda nb, t: (0, 0)),
                    pl.BlockSpec((64, 1), lambda nb, t: (0, 0)),
                ],
                out_specs=pl.BlockSpec((None, 64, tile), lambda nb, t: (nb, 0, t)),
            ),
            compiler_params=pltpu.CompilerParams(
                dimension_semantics=("parallel", "parallel"),
                vmem_limit_bytes=vmem_bytes),
        )(patches, w_blk, b_mat)
        return out[:, :, :hw].reshape(n, 64, hp, wp)

    # --- Fold-batch path (tiny spatial): batch folded into the GEMM lane axis. ---
    m = n * hw
    tile = _pick_tile(m, max_tile_m)
    m_pad = pl.cdiv(m, tile) * tile
    # P[9*(2a+b)+k, n*hw + i*wp + j] = x_pad[n, 2i+a+dh, 2j+b+dw]
    patches = taps.transpose(3, 5, 0, 1, 2, 4).reshape(36, m)
    patches = _pad_last(patches, m_pad)
    out_cm = pl.pallas_call(
        _feature_kernel,
        out_shape=jax.ShapeDtypeStruct((64, m_pad), jnp.float32),
        grid_spec=pltpu.PrefetchScalarGridSpec(
            num_scalar_prefetch=0,
            grid=(m_pad // tile,),
            in_specs=[
                pl.BlockSpec((36, tile), lambda i: (0, i)),     # patches^T tiles
                pl.BlockSpec((256, 36), lambda i: (0, 0)),      # weight (resident)
                pl.BlockSpec((64, 1), lambda i: (0, 0)),        # bias (resident)
            ],
            out_specs=pl.BlockSpec((64, tile), lambda i: (0, i)),
        ),
        compiler_params=pltpu.CompilerParams(
            dimension_semantics=("parallel",),
            vmem_limit_bytes=vmem_bytes),
    )(patches, w_blk, b_mat)
    # (64, N*hw) channel-major -> NCHW.  Only taken when N*hw is small, so this
    # transpose touches little data.
    return out_cm[:, :m].reshape(64, n, hp, wp).transpose(1, 0, 2, 3)


def _reference(x, w, b):
    """Pure-JAX reference (XLA conv + reduce_window)."""
    r = jax.lax.conv_general_dilated(
        x, w, window_strides=(1, 1), padding=((1, 1), (1, 1)),
        dimension_numbers=("NCHW", "OIHW", "NCHW"))
    r = jnp.maximum(r + b.reshape(1, 64, 1, 1), 0.0)
    return jax.lax.reduce_window(r, -jnp.inf, jax.lax.max,
                                 (1, 1, 2, 2), (1, 1, 2, 2), "VALID")


if __name__ == "__main__":
    key = jax.random.PRNGKey(0)
    kx, kx2, kw, kb = jax.random.split(key, 4)

    # Deterministic parameter init (shapes from nn.Conv2d(1, 64, 3)):
    # kaiming-uniform-style bound = 1/sqrt(fan_in) = 1/3 for fan_in = 1*3*3.
    bound = 1.0 / 3.0
    w = jax.random.uniform(kw, (64, 1, 3, 3), jnp.float32, -bound, bound)
    b = jax.random.uniform(kb, (64,), jnp.float32, -bound, bound)

    # Case 1: small spatial (fold-batch path).  Input (batch=2, 1, 16, 16).
    x = jax.random.normal(kx, (2, 1, 16, 16), jnp.float32)
    out = jax.block_until_ready(feature_extractor(x, w, b))
    assert out.shape == (2, 64, 8, 8), out.shape
    ref = _reference(x, w, b)
    assert jnp.allclose(out, ref, atol=1e-4, rtol=1e-4), \
        float(jnp.max(jnp.abs(out - ref)))

    # Case 2: larger spatial (direct-NCHW path, 2-D grid, no output transpose).
    x2 = jax.random.normal(kx2, (1, 1, 64, 64), jnp.float32)
    out2 = jax.block_until_ready(feature_extractor(x2, w, b))
    assert out2.shape == (1, 64, 32, 32), out2.shape
    ref2 = _reference(x2, w, b)
    assert jnp.allclose(out2, ref2, atol=1e-4, rtol=1e-4), \
        float(jnp.max(jnp.abs(out2 - ref2)))

    print("KERNEL_OK")
</pallas_src>

<mosaic_0001>
module attributes {stable_mosaic.version = 11 : i64} {
  func.func @_feature_kernel(%arg0: i32, %arg1: memref<36x128xf32, #tpu.memory_space<vmem>>, %arg2: memref<256x36xf32, #tpu.memory_space<vmem>>, %arg3: memref<64x1xf32, #tpu.memory_space<vmem>>, %arg4: memref<64x128xf32, #tpu.memory_space<vmem>>) attributes {dimension_semantics = [#tpu.dimension_semantics<parallel>], iteration_bounds = array<i64: 1>, scalar_prefetch = 0 : i64, scratch_operands = 0 : i64, tpu.core_type = #tpu.core_type<tc>, window_params = [{transform_indices = @transform_0, window_bounds = array<i64: 36, 128>}, {pipeline_mode = #tpu.pipeline_mode<synchronous>, transform_indices = @transform_1, window_bounds = array<i64: 256, 36>}, {pipeline_mode = #tpu.pipeline_mode<synchronous>, transform_indices = @transform_2, window_bounds = array<i64: 64, 1>}, {transform_indices = @transform_3, window_bounds = array<i64: 64, 128>}]} {
    %c0 = arith.constant 0 : index
    %c0_0 = arith.constant 0 : index
    %0 = vector.load %arg2[%c0, %c0_0] : memref<256x36xf32, #tpu.memory_space<vmem>>, vector<256x36xf32>
    %c0_1 = arith.constant 0 : index
    %c0_2 = arith.constant 0 : index
    %1 = vector.load %arg1[%c0_1, %c0_2] : memref<36x128xf32, #tpu.memory_space<vmem>>, vector<36x128xf32>
    %cst = arith.constant dense<0.000000e+00> : vector<256x128xf32>
    %2 = tpu.matmul %0, %1, %cst {dimension_numbers = #tpu.dot_dimension_numbers<[1], [0], [0], [1], [0, 0, 1, 1], [], []>} : vector<256x36xf32>, vector<36x128xf32>, vector<256x128xf32> -> vector<256x128xf32>
    %3 = vector.extract_strided_slice %2 {offsets = [0, 0], sizes = [64, 128], strides = [1, 1]} : vector<256x128xf32> to vector<64x128xf32>
    %4 = vector.extract_strided_slice %2 {offsets = [64, 0], sizes = [64, 128], strides = [1, 1]} : vector<256x128xf32> to vector<64x128xf32>
    %5 = arith.maximumf %3, %4 : vector<64x128xf32>
    %6 = vector.extract_strided_slice %2 {offsets = [128, 0], sizes = [64, 128], strides = [1, 1]} : vector<256x128xf32> to vector<64x128xf32>
    %7 = vector.extract_strided_slice %2 {offsets = [192, 0], sizes = [64, 128], strides = [1, 1]} : vector<256x128xf32> to vector<64x128xf32>
    %8 = arith.maximumf %6, %7 : vector<64x128xf32>
    %9 = arith.maximumf %5, %8 : vector<64x128xf32>
    %c0_3 = arith.constant 0 : index
    %c0_4 = arith.constant 0 : index
    %10 = vector.load %arg3[%c0_3, %c0_4] : memref<64x1xf32, #tpu.memory_space<vmem>>, vector<64x1xf32>
    %11 = vector.broadcast %10 : vector<64x1xf32> to vector<64x128xf32>
    %12 = arith.addf %9, %11 : vector<64x128xf32>
    %cst_5 = arith.constant 0.000000e+00 : f32
    %13 = vector.broadcast %cst_5 : f32 to vector<64x128xf32>
    %14 = arith.maximumf %12, %13 : vector<64x128xf32>
    %c0_6 = arith.constant 0 : index
    %c0_7 = arith.constant 0 : index
    %15 = vector.load %arg4[%c0_6, %c0_7] : memref<64x128xf32, #tpu.memory_space<vmem>>, vector<64x128xf32>
    tpu.vector_store %arg4[%c0_6, %c0_7], %14 {strides = array<i32>} : memref<64x128xf32, #tpu.memory_space<vmem>>, vector<64x128xf32>,
    return
  }
  func.func @transform_0(%arg0: i32) -> (i32, i32) {
    %c0_i32 = arith.constant 0 : i32
    %c0_i32_0 = arith.constant 0 : i32
    return %c0_i32, %arg0 : i32, i32
  }
  func.func @transform_1(%arg0: i32) -> (i32, i32) {
    %c0_i32 = arith.constant 0 : i32
    %c0_i32_0 = arith.constant 0 : i32
    %c0_i32_1 = arith.constant 0 : i32
    return %c0_i32, %c0_i32_0 : i32, i32
  }
  func.func @transform_2(%arg0: i32) -> (i32, i32) {
    %c0_i32 = arith.constant 0 : i32
    %c0_i32_0 = arith.constant 0 : i32
    %c0_i32_1 = arith.constant 0 : i32
    return %c0_i32, %c0_i32_0 : i32, i32
  }
  func.func @transform_3(%arg0: i32) -> (i32, i32) {
    %c0_i32 = arith.constant 0 : i32
    %c0_i32_0 = arith.constant 0 : i32
    return %c0_i32, %arg0 : i32, i32
  }
}

</mosaic_0001>

<bundles_post_ra>
// kernel: tpu_custom_call.1
= control target key start
LH: loop header
LB: loop body
LE: loop exit
PB: predicated region body
PF: predicated region fallthrough
CT: control target
= control target key end

     0   :  { %vm149_vm0 = vcmask 1043456   ;;  %vm52_vm1 = vcmask 293888   ;;  %s655_s0 = inlined_call_operand.vmem [shape: f32[36,128], index: 0, kind: input, shape index: {}]   ;;  %s656_s1 = inlined_call_operand.vmem [shape: f32[256,36], index: 1, kind: input, shape index: {}]   ;;  %s657_s2 = inlined_call_operand.vmem [shape: f32[64,1], index: 2, kind: input, shape index: {}]   ;;  %s658_s3 = inlined_call_operand.hbm [shape: f32[64,128], index: 3, kind: output, shape index: {}]  }
   0x1   :  { %v51_v0 = vld [vmem:[%s655_s0 + $0x20] sm:$0xf]  ;;  %v50_v1 = vld [vmem:[%s655_s0 + $0x18] sm:$0xff]  ;;  %v49_v2 = vld [vmem:[%s655_s0 + $0x10] sm:$0xff] }
   0x2   :  { %414 = vmatpush.msk.msra.mxu2 %vm149_vm0, %v51_v0  ;;  %415 = vmatpush.msk.msra.mxu3 %vm149_vm0, %v51_v0  ;;  %v48_v3 = vld [vmem:[%s655_s0 + $0x8] sm:$0xff]  ;;  %v47_v4 = vld [vmem:[%s655_s0] sm:$0xff] }
   0x3   :  { %380 = vmatpush.msk.msra.mxu0 %vm149_vm0, %v51_v0  ;;  %413 = vmatpush.msk.msra.mxu1 %vm149_vm0, %v51_v0  ;;  %v31_v5 = vld [vmem:[%s656_s1 + $0x80] sm:$0xff] }
   0x4   :  { %417 = vmatpush.msra.mxu2 %v50_v1  ;;  %418 = vmatpush.msra.mxu3 %v50_v1  ;;  %v39_v6 = vld [vmem:[%s656_s1 + $0xc0] sm:$0xff] }
   0x5   :  { %165 = vmatpush.msra.mxu0 %v50_v1  ;;  %416 = vmatpush.msra.mxu1 %v50_v1 }
   0x6   :  { %420 = vmatpush.msra.mxu2 %v49_v2  ;;  %421 = vmatpush.msra.mxu3 %v49_v2 }
   0x7   :  { %166 = vmatpush.msra.mxu0 %v49_v2  ;;  %419 = vmatpush.msra.mxu1 %v49_v2 }
   0x8   :  { %423 = vmatpush.msra.mxu2 %v48_v3  ;;  %424 = vmatpush.msra.mxu3 %v48_v3 }
   0x9   :  { %167 = vmatpush.msra.mxu0 %v48_v3  ;;  %422 = vmatpush.msra.mxu1 %v48_v3 }
   0xa   :  { %8 = vsyncpa [#allocation3], 0  ;;  %426 = vmatpush.msra.mxu2 %v47_v4  ;;  %427 = vmatpush.msra.mxu3 %v47_v4  ;;  %v15_v7 = vld [vmem:[%s656_s1] sm:$0xff]  ;;  %v292_v10 = vld [vmem:[%s657_s2 + $0x10] sm:$0xff]  ;;  %v461_v11 = vmov 0   ;;  %s368_s20 = sshll.u32 %s658_s3, 4  ;;  %s369_s20 = int_to_ptr.hbm [resolvable:$true] %s368_s20 }
   0xb   :  { %v23_v8 = vld [vmem:[%s656_s1 + $0x40] sm:$0xff]  ;;  %397 = vmatmul.msk.f32.vlgmr.msra.gmra.mxu2 %vm52_vm1, %v31_v5  ;;  %405 = vmatmul.msk.f32.vlgmr.msra.gmra.mxu3 %vm52_vm1, %v39_v6  ;;  %v32_v12 = vld [vmem:[%s656_s1 + $0x88] sm:$0xff]  ;;  %v293_v17 = vld [vmem:[%s657_s2 + $0x18] sm:$0xff]  ;;  %s463_s21 = smov 128   ;;  %s464_s22 = smov 8  }
   0xc   :  { %168 = vmatpush.msra.mxu0 %v47_v4  ;;  %425 = vmatpush.msra.mxu1 %v47_v4  ;;  %v290_v9 = vld [vmem:[%s657_s2] sm:$0xff]  ;;  %v40_v13 = vld [vmem:[%s656_s1 + $0xc8] sm:$0xff]  ;;  %v33_v18 = vld [vmem:[%s656_s1 + $0x90] sm:$0xff] }
   0xd   :  { %381 = vmatmul.msk.f32.vlgmr.msra.gmra.mxu0 %vm52_vm1, %v15_v7  ;;  %389 = vmatmul.msk.f32.vlgmr.msra.gmra.mxu1 %vm52_vm1, %v23_v8  ;;  %v16_v14 = vld [vmem:[%s656_s1 + $0x8] sm:$0xff]  ;;  %v41_v19 = vld [vmem:[%s656_s1 + $0xd0] sm:$0xff]  ;;  %v34_v22 = vld [vmem:[%s656_s1 + $0x98] sm:$0xff] }
   0xe   :  { %432 = vset.pattern.permute.xlu0 %v461_v11  ;;  %433 = vset.pattern.permute.xlu1 %v461_v11  ;;  %v24_v15 = vld [vmem:[%s656_s1 + $0x48] sm:$0xff]  ;;  %v17_v20 = vld [vmem:[%s656_s1 + $0x10] sm:$0xff]  ;;  %v42_v23 = vld [vmem:[%s656_s1 + $0xd8] sm:$0xff] }
   0xf   :  { %300 = vperm.xlu0 %432, %v290_v9   ;;  %310 = vperm.xlu1 %433, %v292_v10   ;;  %v291_v16 = vld [vmem:[%s657_s2 + $0x8] sm:$0xff]  ;;  %v25_v21 = vld [vmem:[%s656_s1 + $0x50] sm:$0xff]  ;;  %v18_v24 = vld [vmem:[%s656_s1 + $0x18] sm:$0xff] }
  0x10   :  { %434 = vset.pattern.permute.xlu2 %v461_v11  ;;  %v26_v25 = vld [vmem:[%s656_s1 + $0x58] sm:$0xff]  ;;  %v296_v27 = vld [vmem:[%s657_s2 + $0x30] sm:$0xff]  ;;  %v294_v28 = vld [vmem:[%s657_s2 + $0x20] sm:$0xff] }
  0x11   :  { %v297_v26 = vld [vmem:[%s657_s2 + $0x38] sm:$0xff]  ;;  %320 = vperm.xlu2 %434, %v294_v28   ;;  %v35_v29 = vld [vmem:[%s656_s1 + $0xa0] sm:$0xff]  ;;  %v295_v33 = vld [vmem:[%s657_s2 + $0x28] sm:$0xff] }
  0x12   :  { %v43_v30 = vld [vmem:[%s656_s1 + $0xe0] sm:$0xff]  ;;  %v36_v34 = vld [vmem:[%s656_s1 + $0xa8] sm:$0xff]  ;;  %v37_v38 = vld [vmem:[%s656_s1 + $0xb0] sm:$0xff] }
  0x13   :  { %398 = vmatmul.msk.f32.gmra.mxu2 %vm52_vm1, %v32_v12  ;;  %406 = vmatmul.msk.f32.gmra.mxu3 %vm52_vm1, %v40_v13  ;;  %v19_v31 = vld [vmem:[%s656_s1 + $0x20] sm:$0xff]  ;;  %v44_v35 = vld [vmem:[%s656_s1 + $0xe8] sm:$0xff]  ;;  %v45_v39 = vld [vmem:[%s656_s1 + $0xf0] sm:$0xff] }
  0x14   :  { %v27_v32 = vld [vmem:[%s656_s1 + $0x60] sm:$0xff]  ;;  %v20_v36 = vld [vmem:[%s656_s1 + $0x28] sm:$0xff]  ;;  %v21_v40 = vld [vmem:[%s656_s1 + $0x30] sm:$0xff] }
  0x15   :  { %382 = vmatmul.msk.f32.gmra.mxu0 %vm52_vm1, %v16_v14  ;;  %390 = vmatmul.msk.f32.gmra.mxu1 %vm52_vm1, %v24_v15  ;;  %v28_v37 = vld [vmem:[%s656_s1 + $0x68] sm:$0xff]  ;;  %v29_v41 = vld [vmem:[%s656_s1 + $0x70] sm:$0xff]  ;;  %v38_v42 = vld [vmem:[%s656_s1 + $0xb8] sm:$0xff] }
  0x16   :  { %v46_v43 = vld [vmem:[%s656_s1 + $0xf8] sm:$0xff] }
  0x17   :  { %305 = vperm.xlu0 %432, %v291_v16   ;;  %315 = vperm.xlu1 %433, %v293_v17   ;;  %v22_v44 = vld [vmem:[%s656_s1 + $0x38] sm:$0xff] }
  0x18   :  { %v30_v45 = vld [vmem:[%s656_s1 + $0x78] sm:$0xff]  ;;  %s462_s1 = smov [#allocation2]  }
  0x19   :  { %325 = vperm.xlu2 %434, %v295_v33   ;;  %s366_s17 = sshll.u32 %s462_s1, 4  ;;  %s367_s17 = int_to_ptr.vmem [resolvable:$true] %s366_s17 }
  0x1b   :  { %399 = vmatmul.msk.f32.gmra.mxu2 %vm52_vm1, %v33_v18  ;;  %407 = vmatmul.msk.f32.gmra.mxu3 %vm52_vm1, %v41_v19 }
  0x1d   :  { %383 = vmatmul.msk.f32.gmra.mxu0 %vm52_vm1, %v17_v20  ;;  %391 = vmatmul.msk.f32.gmra.mxu1 %vm52_vm1, %v25_v21 }
  0x1f   :  { %335 = vperm.xlu1 %433, %v297_v26   ;;  %330 = vperm.xlu0 %432, %v296_v27  }
  0x23   :  { %400 = vmatmul.msk.f32.gmra.mxu2 %vm52_vm1, %v34_v22  ;;  %408 = vmatmul.msk.f32.gmra.mxu3 %vm52_vm1, %v42_v23 }
  0x25   :  { %384 = vmatmul.msk.f32.gmra.mxu0 %vm52_vm1, %v18_v24  ;;  %392 = vmatmul.msk.f32.gmra.mxu1 %vm52_vm1, %v26_v25 }
  0x2b   :  { %401 = vmatmul.msk.f32.gmra.mxu2 %vm52_vm1, %v35_v29  ;;  %409 = vmatmul.msk.f32.gmra.mxu3 %vm52_vm1, %v43_v30 }
  0x2d   :  { %385 = vmatmul.msk.f32.gmra.mxu0 %vm52_vm1, %v19_v31  ;;  %393 = vmatmul.msk.f32.gmra.mxu1 %vm52_vm1, %v27_v32 }
  0x33   :  { %402 = vmatmul.msk.f32.gmra.mxu2 %vm52_vm1, %v36_v34  ;;  %410 = vmatmul.msk.f32.gmra.mxu3 %vm52_vm1, %v44_v35 }
  0x35   :  { %386 = vmatmul.msk.f32.gmra.mxu0 %vm52_vm1, %v20_v36  ;;  %394 = vmatmul.msk.f32.gmra.mxu1 %vm52_vm1, %v28_v37 }
  0x3b   :  { %403 = vmatmul.msk.f32.gmra.mxu2 %vm52_vm1, %v37_v38  ;;  %411 = vmatmul.msk.f32.gmra.mxu3 %vm52_vm1, %v45_v39 }
  0x3d   :  { %387 = vmatmul.msk.f32.gmra.mxu0 %vm52_vm1, %v21_v40  ;;  %395 = vmatmul.msk.f32.gmra.mxu1 %vm52_vm1, %v29_v41 }
  0x43   :  { %404 = vmatmul.msk.f32.gmra.mxu2 %vm52_vm1, %v38_v42  ;;  %412 = vmatmul.msk.f32.gmra.mxu3 %vm52_vm1, %v46_v43 }
  0x45   :  { %388 = vmatmul.msk.f32.gmra.mxu0 %vm52_vm1, %v22_v44  ;;  %396 = vmatmul.msk.f32.gmra.mxu1 %vm52_vm1, %v30_v45 }
  0x6b   :  { %v321_v25 = vpop.permute.xlu2 %320 }
  0x73   :  { %v326_v38 = vpop.permute.xlu2 %325 }
  0x81   :  { %v301_v49 = vpop.permute.xlu0 %300  ;;  %v311_v5 = vpop.permute.xlu1 %310 }
  0x89   :  { %v306_v62 = vpop.permute.xlu0 %305  ;;  %v316_v18 = vpop.permute.xlu1 %315 }
  0x8a   :  { %v170_v46 = vpop.f32.mrf.mxu0  ;;  %v194_v47 = vpop.f32.mrf.mxu1 }
  0x8b   :  { %v266_v48 = vmax.f32 %v170_v46, %v194_v47 }
  0x8e   :  { %v218_v50 = vpop.f32.mrf.mxu2  ;;  %v242_v51 = vpop.f32.mrf.mxu3 }
  0x8f   :  { %v274_v52 = vmax.f32 %v218_v50, %v242_v51 }
  0x91   :  { %v282_v53 = vmax.f32 %v266_v48, %v274_v52  ;;  %v331_v48 = vpop.permute.xlu0 %330 }
  0x92   :  { %v173_v54 = vpop.f32.mrf.mxu0  ;;  %v197_v55 = vpop.f32.mrf.mxu1 }
  0x93   :  { %v338_v56 = vadd.f32 %v301_v49, %v282_v53  ;;  %v267_v58 = vmax.f32 %v173_v54, %v197_v55 }
  0x95   :  { %v346_v57 = vmax.f32 %v338_v56, 0.0 }
  0x96   :  { %v221_v59 = vpop.f32.mrf.mxu2  ;;  %v245_v60 = vpop.f32.mrf.mxu3 }
  0x97   :  { %354 = vst [vmem:[#allocation2] sm:$0xff] %v346_v57  ;;  %v275_v61 = vmax.f32 %v221_v59, %v245_v60  ;;  %v336_v59 = vpop.permute.xlu1 %335 }
  0x99   :  { %v283_v63 = vmax.f32 %v267_v58, %v275_v61 }
  0x9a   :  { %v176_v0 = vpop.f32.mrf.mxu0  ;;  %v200_v1 = vpop.f32.mrf.mxu1 }
  0x9b   :  { %v339_v2 = vadd.f32 %v306_v62, %v283_v63  ;;  %v268_v4 = vmax.f32 %v176_v0, %v200_v1 }
  0x9d   :  { %v347_v3 = vmax.f32 %v339_v2, 0.0 }
  0x9e   :  { %v224_v6 = vpop.f32.mrf.mxu2  ;;  %v248_v7 = vpop.f32.mrf.mxu3 }
  0x9f   :  { %355 = vst [vmem:[#allocation2 + $0x8] sm:$0xff] %v347_v3  ;;  %v276_v8 = vmax.f32 %v224_v6, %v248_v7 }
  0xa1   :  { %v284_v9 = vmax.f32 %v268_v4, %v276_v8 }
  0xa2   :  { %v179_v10 = vpop.f32.mrf.mxu0  ;;  %v203_v11 = vpop.f32.mrf.mxu1 }
  0xa3   :  { %v340_v12 = vadd.f32 %v311_v5, %v284_v9  ;;  %v269_v14 = vmax.f32 %v179_v10, %v203_v11 }
  0xa5   :  { %v348_v13 = vmax.f32 %v340_v12, 0.0 }
  0xa6   :  { %v227_v15 = vpop.f32.mrf.mxu2  ;;  %v251_v16 = vpop.f32.mrf.mxu3 }
  0xa7   :  { %356 = vst [vmem:[#allocation2 + $0x10] sm:$0xff] %v348_v13  ;;  %v277_v17 = vmax.f32 %v227_v15, %v251_v16 }
  0xa9   :  { %v285_v19 = vmax.f32 %v269_v14, %v277_v17 }
  0xaa   :  { %v182_v20 = vpop.f32.mrf.mxu0  ;;  %v206_v21 = vpop.f32.mrf.mxu1 }
  0xab   :  { %v341_v22 = vadd.f32 %v316_v18, %v285_v19  ;;  %v270_v24 = vmax.f32 %v182_v20, %v206_v21 }
  0xad   :  { %v349_v23 = vmax.f32 %v341_v22, 0.0 }
  0xae   :  { %v230_v26 = vpop.f32.mrf.mxu2  ;;  %v254_v27 = vpop.f32.mrf.mxu3 }
  0xaf   :  { %357 = vst [vmem:[#allocation2 + $0x18] sm:$0xff] %v349_v23  ;;  %v278_v28 = vmax.f32 %v230_v26, %v254_v27 }
  0xb1   :  { %v286_v29 = vmax.f32 %v270_v24, %v278_v28 }
  0xb2   :  { %v185_v30 = vpop.f32.mrf.mxu0  ;;  %v209_v31 = vpop.f32.mrf.mxu1 }
  0xb3   :  { %v342_v32 = vadd.f32 %v321_v25, %v286_v29  ;;  %v271_v34 = vmax.f32 %v185_v30, %v209_v31 }
  0xb5   :  { %v350_v33 = vmax.f32 %v342_v32, 0.0 }
  0xb6   :  { %v233_v35 = vpop.f32.mrf.mxu2  ;;  %v257_v36 = vpop.f32.mrf.mxu3 }
  0xb7   :  { %358 = vst [vmem:[#allocation2 + $0x20] sm:$0xff] %v350_v33  ;;  %v279_v37 = vmax.f32 %v233_v35, %v257_v36 }
  0xb9   :  { %v287_v39 = vmax.f32 %v271_v34, %v279_v37 }
  0xba   :  { %v188_v40 = vpop.f32.mrf.mxu0  ;;  %v212_v41 = vpop.f32.mrf.mxu1 }
  0xbb   :  { %v343_v42 = vadd.f32 %v326_v38, %v287_v39  ;;  %v272_v44 = vmax.f32 %v188_v40, %v212_v41 }
  0xbd   :  { %v351_v43 = vmax.f32 %v343_v42, 0.0 }
  0xbe   :  { %v236_v45 = vpop.f32.mrf.mxu2  ;;  %v260_v46 = vpop.f32.mrf.mxu3 }
  0xbf   :  { %359 = vst [vmem:[#allocation2 + $0x28] sm:$0xff] %v351_v43  ;;  %v280_v47 = vmax.f32 %v236_v45, %v260_v46 }
  0xc1   :  { %v288_v49 = vmax.f32 %v272_v44, %v280_v47 }
  0xc2   :  { %v191_v50 = vpop.f32.mrf.mxu0  ;;  %v215_v51 = vpop.f32.mrf.mxu1 }
  0xc3   :  { %v344_v52 = vadd.f32 %v331_v48, %v288_v49  ;;  %v273_v54 = vmax.f32 %v191_v50, %v215_v51 }
  0xc5   :  { %v352_v53 = vmax.f32 %v344_v52, 0.0 }
  0xc6   :  { %v239_v55 = vpop.f32.mrf.mxu2  ;;  %v263_v56 = vpop.f32.mrf.mxu3 }
  0xc7   :  { %360 = vst [vmem:[#allocation2 + $0x30] sm:$0xff] %v352_v53  ;;  %v281_v57 = vmax.f32 %v239_v55, %v263_v56 }
  0xc9   :  { %v289_v58 = vmax.f32 %v273_v54, %v281_v57 }
  0xcb   :  { %v345_v60 = vadd.f32 %v336_v59, %v289_v58 }
  0xcd   :  { %v353_v61 = vmax.f32 %v345_v60, 0.0 }
  0xcf   :  { %361 = vst [vmem:[#allocation2 + $0x38] sm:$0xff] %v353_v61 }
  0xd0   :  { %374 = dma.vmem_to_hbm [thread:$0]  %s367_s17, 1024, %s369_s20, [#allocation3], %s463_s21, %s463_s21, %s464_s22  }
  0xd1   :  { %459 = dma.done.wait [#allocation3], 1024  }
  0xd2   :  { %460 = vsyncadd [#allocation3], 4294966272 }
  0xd3   :  { %379 = vsyncpa [#allocation3], 1 }

</bundles_post_ra>
